<compile_context>
chip_gen: v5e
topology: v5e:2x2
jax: 0.10.0
libtpu: 0.0.40
codegen_flags: <defaults>
</compile_context>

<pallas_src>
import functools

import jax
import jax.numpy as jnp
from jax import lax
from jax.experimental import pallas as pl
from jax.experimental.pallas import tpu as pltpu


def _round_up(x, m):
    return (x + m - 1) // m * m


# --------------------------------------------------------------------------- #
# Pallas kernel: one SAGEConv layer (tiled aggregation + two linears + act)
# --------------------------------------------------------------------------- #
def sage_layer_kernel(a_ref, x_ref, xt_ref, invdeg_ref, wl_ref, wr_ref, b_ref,
                      o_ref, acc_ref, *, c_out_valid, apply_relu,
                      apply_logsoftmax):
    k = pl.program_id(1)

    @pl.when(k == 0)
    def _():
        acc_ref[...] = jnp.zeros_like(acc_ref)

    # Accumulate un-normalized neighbor sums: acc += A_tile @ x_tile
    # (bf16 MXU operands, f32 accumulation; A holds exact small edge counts).
    acc_ref[...] += jnp.dot(a_ref[...], x_ref[...],
                            preferred_element_type=jnp.float32)

    @pl.when(k == pl.num_programs(1) - 1)
    def _():
        # mean aggregation: scale by 1/deg on the VPU (free slot vs MXU).
        agg = (acc_ref[...] * invdeg_ref[...]).astype(wl_ref.dtype)
        h = jnp.dot(agg, wl_ref[...], preferred_element_type=jnp.float32)
        h = h + jnp.dot(xt_ref[...], wr_ref[...],
                        preferred_element_type=jnp.float32)
        h = h + b_ref[...]
        if apply_relu:
            h = jnp.maximum(h, 0.0)
            # TODO(synk): F.dropout(p=0.5) is identity in eval mode; training-mode
            # randomness is not reproduced.
        if apply_logsoftmax:
            if c_out_valid < h.shape[-1]:
                # Mask padded output lanes so they do not pollute the softmax.
                col = lax.broadcasted_iota(jnp.int32, h.shape, 1)
                h = jnp.where(col < c_out_valid, h, -jnp.inf)
            m = jnp.max(h, axis=-1, keepdims=True)
            s = h - m
            lse = jnp.log(jnp.sum(jnp.exp(s), axis=-1, keepdims=True))
            h = s - lse
        o_ref[...] = h.astype(o_ref.dtype)


def sage_layer(A01, inv_deg, x, x_target, w_l, w_r, b_l, *,
               apply_relu, apply_logsoftmax, tm=256, tk=512):
    """One SAGEConv layer.

    A01:      [n_dst, n_src]  un-normalized edge-count adjacency (small ints)
    inv_deg:  [n_dst, 1]      1 / max(deg, 1)
    x:        [n_src, c_in]   source node features
    x_target: [n_dst, c_in]   destination node features (root term)
    w_l, w_r: [c_in, c_out]   weights stored transposed (x @ W)
    b_l:      [1, c_out]
    """
    n_dst, n_src = A01.shape
    c_in = x.shape[1]
    c_out = w_l.shape[1]

    # Channel dims padded to lane-dense multiples of 128.
    c_in_p = _round_up(c_in, 128)
    c_out_p = _round_up(c_out, 128)
    # Tile sizes clamped to (padded) problem size; dst tile multiple of 8,
    # src (reduction) tile multiple of 128.
    tm = min(tm, _round_up(n_dst, 8))
    tk = min(tk, _round_up(n_src, 128))
    n_dst_p = _round_up(n_dst, tm)
    n_src_p = _round_up(n_src, tk)

    bf16 = jnp.bfloat16
    A_p = jnp.zeros((n_dst_p, n_src_p), bf16).at[:n_dst, :n_src].set(
        A01.astype(bf16))
    x_p = jnp.zeros((n_src_p, c_in_p), bf16).at[:n_src, :c_in].set(
        x.astype(bf16))
    xt_p = jnp.zeros((n_dst_p, c_in_p), bf16).at[:n_dst, :c_in].set(
        x_target.astype(bf16))
    inv_p = jnp.ones((n_dst_p, 1), jnp.float32).at[:n_dst, :].set(
        inv_deg.astype(jnp.float32))
    wl_p = jnp.zeros((c_in_p, c_out_p), bf16).at[:c_in, :c_out].set(
        w_l.astype(bf16))
    wr_p = jnp.zeros((c_in_p, c_out_p), bf16).at[:c_in, :c_out].set(
        w_r.astype(bf16))
    b_p = jnp.zeros((1, c_out_p), jnp.float32).at[:, :c_out].set(
        b_l.astype(jnp.float32))

    grid = (n_dst_p // tm, n_src_p // tk)

    kernel = functools.partial(sage_layer_kernel,
                               c_out_valid=c_out,
                               apply_relu=apply_relu,
                               apply_logsoftmax=apply_logsoftmax)

    out_p = pl.pallas_call(
        kernel,
        out_shape=jax.ShapeDtypeStruct((n_dst_p, c_out_p), jnp.float32),
        grid_spec=pltpu.PrefetchScalarGridSpec(
            num_scalar_prefetch=0,
            grid=grid,
            in_specs=[
                pl.BlockSpec((tm, tk), lambda i, k: (i, k)),            # A tile
                pl.BlockSpec((tk, c_in_p), lambda i, k: (k, 0)),        # x (src feats)
                pl.BlockSpec((tm, c_in_p), lambda i, k: (i, 0)),        # x_target
                pl.BlockSpec((tm, 1), lambda i, k: (i, 0)),             # 1/deg
                pl.BlockSpec((c_in_p, c_out_p), lambda i, k: (0, 0)),   # W_l (resident)
                pl.BlockSpec((c_in_p, c_out_p), lambda i, k: (0, 0)),   # W_r (resident)
                pl.BlockSpec((1, c_out_p), lambda i, k: (0, 0)),        # b_l (resident)
            ],
            out_specs=pl.BlockSpec((tm, c_out_p), lambda i, k: (i, 0)),
            scratch_shapes=[pltpu.VMEM((tm, c_in_p), jnp.float32)],     # agg acc
        ),
        compiler_params=pltpu.CompilerParams(
            dimension_semantics=("parallel", "arbitrary"),
            vmem_limit_bytes=48 * 1024 * 1024,
        ),
    )(A_p, x_p, xt_p, inv_p, wl_p, wr_p, b_p)

    return out_p[:n_dst, :c_out]


# --------------------------------------------------------------------------- #
# Glue: edge_index -> edge-count adjacency (bf16 in kernel) + 1/deg vector
# --------------------------------------------------------------------------- #
def build_adj_and_invdeg(edge_index, n_src, n_dst):
    src = edge_index[0]
    dst = edge_index[1]
    A = jnp.zeros((n_dst, n_src), jnp.float32).at[dst, src].add(1.0)
    deg = A.sum(axis=1, keepdims=True)
    inv_deg = 1.0 / jnp.where(deg == 0.0, 1.0, deg)
    return A, inv_deg


# --------------------------------------------------------------------------- #
# SAGE forward (eval mode): loop over layers, each layer is one Pallas call
# --------------------------------------------------------------------------- #
def sage_forward(x, adjs, params, num_layers):
    # TODO(synk): the distributed inference path (GASStore scatter/gather) of the
    # original module is host/comm plumbing, not reproduced here.
    for i, (edge_index, _, size) in enumerate(adjs):
        n_src, n_dst = size
        x_target = x[:n_dst]
        A, inv_deg = build_adj_and_invdeg(edge_index, n_src, n_dst)
        w_l, b_l, w_r = params[i]
        is_last = (i == num_layers - 1)
        x = sage_layer(A, inv_deg, x, x_target, w_l, w_r, b_l,
                       apply_relu=not is_last,
                       apply_logsoftmax=is_last)
    return x


# --------------------------------------------------------------------------- #
# Pure-JAX f32 reference (for correctness check)
# --------------------------------------------------------------------------- #
def sage_forward_ref(x, adjs, params, num_layers):
    for i, (edge_index, _, size) in enumerate(adjs):
        n_src, n_dst = size
        x_target = x[:n_dst]
        A, inv_deg = build_adj_and_invdeg(edge_index, n_src, n_dst)
        w_l, b_l, w_r = params[i]
        h = ((A @ x) * inv_deg) @ w_l + x_target @ w_r + b_l
        if i != num_layers - 1:
            h = jnp.maximum(h, 0.0)
        else:
            h = jax.nn.log_softmax(h, axis=-1)
        x = h
    return x


if __name__ == "__main__":
    key = jax.random.PRNGKey(0)

    # Small synthetic problem: 2-layer SAGE, in=16, hidden=32, out=8.
    in_channels, hidden_channels, out_channels, num_layers = 16, 32, 8, 2
    n0, n1, n2 = 24, 16, 8   # sampled-node counts per hop (src -> dst per layer)

    # Deterministic parameters (PyG SAGEConv: lin_l has bias, lin_r has none).
    dims = [(in_channels, hidden_channels), (hidden_channels, out_channels)]
    params = []
    for (ci, co) in dims:
        key, k1, k2, k3 = jax.random.split(key, 4)
        w_l = jax.random.normal(k1, (ci, co), jnp.float32) * 0.1   # stored as W^T
        b_l = jax.random.normal(k2, (1, co), jnp.float32) * 0.1
        w_r = jax.random.normal(k3, (ci, co), jnp.float32) * 0.1   # stored as W^T
        params.append((w_l, b_l, w_r))

    # Deterministic input node features.
    key, kx = jax.random.split(key)
    x = jax.random.normal(kx, (n0, in_channels), jnp.float32)

    # Deterministic bipartite edge lists (src indexes x, dst indexes x_target).
    key, ke1, ke2 = jax.random.split(key, 3)
    e1 = 48
    edge_index_1 = jnp.stack([
        jax.random.randint(ke1, (e1,), 0, n0),                     # sources in [0, n0)
        jnp.concatenate([jnp.arange(n1, dtype=jnp.int32),          # each dst has >=1 edge
                         jax.random.randint(ke1, (e1 - n1,), 0, n1)]),
    ])
    e2 = 32
    edge_index_2 = jnp.stack([
        jax.random.randint(ke2, (e2,), 0, n1),
        jnp.concatenate([jnp.arange(n2, dtype=jnp.int32),
                         jax.random.randint(ke2, (e2 - n2,), 0, n2)]),
    ])

    adjs = [
        (edge_index_1, None, (n0, n1)),
        (edge_index_2, None, (n1, n2)),
    ]

    out = sage_forward(x, adjs, params, num_layers)
    out = jax.block_until_ready(out)

    ref = sage_forward_ref(x, adjs, params, num_layers)
    assert out.shape == (n2, out_channels)
    # bf16 matmul operands -> loosened tolerance vs f32 reference.
    assert jnp.allclose(out, ref, atol=5e-2, rtol=5e-2), (
        float(jnp.max(jnp.abs(out - ref))))

    print("KERNEL_OK")
</pallas_src>

<mosaic_0001>
module attributes {stable_mosaic.version = 11 : i64} {
  func.func @sage_layer_kernel(%arg0: i32, %arg1: i32, %arg2: memref<16x128xbf16, #tpu.memory_space<vmem>>, %arg3: memref<128x128xbf16, #tpu.memory_space<vmem>>, %arg4: memref<16x128xbf16, #tpu.memory_space<vmem>>, %arg5: memref<16x1xf32, #tpu.memory_space<vmem>>, %arg6: memref<128x128xbf16, #tpu.memory_space<vmem>>, %arg7: memref<128x128xbf16, #tpu.memory_space<vmem>>, %arg8: memref<1x128xf32, #tpu.memory_space<vmem>>, %arg9: memref<16x128xf32, #tpu.memory_space<vmem>>, %arg10: memref<16x128xf32, #tpu.memory_space<vmem>>) attributes {dimension_semantics = [#tpu.dimension_semantics<parallel>, #tpu.dimension_semantics<arbitrary>], iteration_bounds = array<i64: 1, 1>, scalar_prefetch = 0 : i64, scratch_operands = 1 : i64, tpu.core_type = #tpu.core_type<tc>, window_params = [{transform_indices = @transform_0, window_bounds = array<i64: 16, 128>}, {transform_indices = @transform_1, window_bounds = array<i64: 128, 128>}, {transform_indices = @transform_2, window_bounds = array<i64: 16, 128>}, {transform_indices = @transform_3, window_bounds = array<i64: 16, 1>}, {pipeline_mode = #tpu.pipeline_mode<synchronous>, transform_indices = @transform_4, window_bounds = array<i64: 128, 128>}, {pipeline_mode = #tpu.pipeline_mode<synchronous>, transform_indices = @transform_5, window_bounds = array<i64: 128, 128>}, {pipeline_mode = #tpu.pipeline_mode<synchronous>, transform_indices = @transform_6, window_bounds = array<i64: 1, 128>}, {transform_indices = @transform_7, window_bounds = array<i64: 16, 128>}]} {
    %c0_i32 = arith.constant 0 : i32
    %0 = arith.cmpi eq, %arg1, %c0_i32 : i32
    %1 = arith.extui %0 : i1 to i32
    %c0_i32_0 = arith.constant 0 : i32
    %2 = arith.cmpi ne, %1, %c0_i32_0 : i32
    scf.if %2 {
      %cst_10 = arith.constant 0.000000e+00 : f32
      %12 = vector.broadcast %cst_10 : f32 to vector<16x128xf32>
      %c0_11 = arith.constant 0 : index
      %c0_12 = arith.constant 0 : index
      %13 = vector.load %arg10[%c0_11, %c0_12] : memref<16x128xf32, #tpu.memory_space<vmem>>, vector<16x128xf32>
      tpu.vector_store %arg10[%c0_11, %c0_12], %12 {strides = array<i32>} : memref<16x128xf32, #tpu.memory_space<vmem>>, vector<16x128xf32>,
    } else {
    }
    %c0 = arith.constant 0 : index
    %c0_1 = arith.constant 0 : index
    %3 = vector.load %arg10[%c0, %c0_1] : memref<16x128xf32, #tpu.memory_space<vmem>>, vector<16x128xf32>
    %c0_2 = arith.constant 0 : index
    %c0_3 = arith.constant 0 : index
    %4 = vector.load %arg2[%c0_2, %c0_3] : memref<16x128xbf16, #tpu.memory_space<vmem>>, vector<16x128xbf16>
    %c0_4 = arith.constant 0 : index
    %c0_5 = arith.constant 0 : index
    %5 = vector.load %arg3[%c0_4, %c0_5] : memref<128x128xbf16, #tpu.memory_space<vmem>>, vector<128x128xbf16>
    %cst = arith.constant dense<0.000000e+00> : vector<16x128xf32>
    %6 = tpu.matmul %4, %5, %cst {dimension_numbers = #tpu.dot_dimension_numbers<[1], [0], [0], [1], [0, 0, 1, 1], [], []>} : vector<16x128xbf16>, vector<128x128xbf16>, vector<16x128xf32> -> vector<16x128xf32>
    %7 = arith.addf %3, %6 : vector<16x128xf32>
    %c0_6 = arith.constant 0 : index
    %c0_7 = arith.constant 0 : index
    %8 = vector.load %arg10[%c0_6, %c0_7] : memref<16x128xf32, #tpu.memory_space<vmem>>, vector<16x128xf32>
    tpu.vector_store %arg10[%c0_6, %c0_7], %7 {strides = array<i32>} : memref<16x128xf32, #tpu.memory_space<vmem>>, vector<16x128xf32>,
    %c0_i32_8 = arith.constant 0 : i32
    %9 = arith.cmpi eq, %arg1, %c0_i32_8 : i32
    %10 = arith.extui %9 : i1 to i32
    %c0_i32_9 = arith.constant 0 : i32
    %11 = arith.cmpi ne, %10, %c0_i32_9 : i32
    scf.if %11 {
      %c0_10 = arith.constant 0 : index
      %c0_11 = arith.constant 0 : index
      %12 = vector.load %arg10[%c0_10, %c0_11] : memref<16x128xf32, #tpu.memory_space<vmem>>, vector<16x128xf32>
      %c0_12 = arith.constant 0 : index
      %c0_13 = arith.constant 0 : index
      %13 = vector.load %arg5[%c0_12, %c0_13] : memref<16x1xf32, #tpu.memory_space<vmem>>, vector<16x1xf32>
      %14 = vector.broadcast %13 : vector<16x1xf32> to vector<16x128xf32>
      %15 = arith.mulf %12, %14 : vector<16x128xf32>
      %16 = arith.truncf %15 : vector<16x128xf32> to vector<16x128xbf16>
      %c0_14 = arith.constant 0 : index
      %c0_15 = arith.constant 0 : index
      %17 = vector.load %arg6[%c0_14, %c0_15] : memref<128x128xbf16, #tpu.memory_space<vmem>>, vector<128x128xbf16>
      %cst_16 = arith.constant dense<0.000000e+00> : vector<16x128xf32>
      %18 = tpu.matmul %16, %17, %cst_16 {dimension_numbers = #tpu.dot_dimension_numbers<[1], [0], [0], [1], [0, 0, 1, 1], [], []>} : vector<16x128xbf16>, vector<128x128xbf16>, vector<16x128xf32> -> vector<16x128xf32>
      %c0_17 = arith.constant 0 : index
      %c0_18 = arith.constant 0 : index
      %19 = vector.load %arg4[%c0_17, %c0_18] : memref<16x128xbf16, #tpu.memory_space<vmem>>, vector<16x128xbf16>
      %c0_19 = arith.constant 0 : index
      %c0_20 = arith.constant 0 : index
      %20 = vector.load %arg7[%c0_19, %c0_20] : memref<128x128xbf16, #tpu.memory_space<vmem>>, vector<128x128xbf16>
      %cst_21 = arith.constant dense<0.000000e+00> : vector<16x128xf32>
      %21 = tpu.matmul %19, %20, %cst_21 {dimension_numbers = #tpu.dot_dimension_numbers<[1], [0], [0], [1], [0, 0, 1, 1], [], []>} : vector<16x128xbf16>, vector<128x128xbf16>, vector<16x128xf32> -> vector<16x128xf32>
      %22 = arith.addf %18, %21 : vector<16x128xf32>
      %c0_22 = arith.constant 0 : index
      %c0_23 = arith.constant 0 : index
      %23 = vector.load %arg8[%c0_22, %c0_23] : memref<1x128xf32, #tpu.memory_space<vmem>>, vector<1x128xf32>
      %24 = vector.broadcast %23 : vector<1x128xf32> to vector<16x128xf32>
      %25 = arith.addf %22, %24 : vector<16x128xf32>
      %cst_24 = arith.constant 0.000000e+00 : f32
      %26 = vector.broadcast %cst_24 : f32 to vector<16x128xf32>
      %27 = arith.maximumf %25, %26 : vector<16x128xf32>
      %c0_25 = arith.constant 0 : index
      %c0_26 = arith.constant 0 : index
      %28 = vector.load %arg9[%c0_25, %c0_26] : memref<16x128xf32, #tpu.memory_space<vmem>>, vector<16x128xf32>
      tpu.vector_store %arg9[%c0_25, %c0_26], %27 {strides = array<i32>} : memref<16x128xf32, #tpu.memory_space<vmem>>, vector<16x128xf32>,
    } else {
    }
    return
  }
  func.func @transform_0(%arg0: i32, %arg1: i32) -> (i32, i32) {
    %c0_i32 = arith.constant 0 : i32
    return %arg0, %arg1 : i32, i32
  }
  func.func @transform_1(%arg0: i32, %arg1: i32) -> (i32, i32) {
    %c0_i32 = arith.constant 0 : i32
    %c0_i32_0 = arith.constant 0 : i32
    return %arg1, %c0_i32 : i32, i32
  }
  func.func @transform_2(%arg0: i32, %arg1: i32) -> (i32, i32) {
    %c0_i32 = arith.constant 0 : i32
    %c0_i32_0 = arith.constant 0 : i32
    return %arg0, %c0_i32 : i32, i32
  }
  func.func @transform_3(%arg0: i32, %arg1: i32) -> (i32, i32) {
    %c0_i32 = arith.constant 0 : i32
    %c0_i32_0 = arith.constant 0 : i32
    return %arg0, %c0_i32 : i32, i32
  }
  func.func @transform_4(%arg0: i32, %arg1: i32) -> (i32, i32) {
    %c0_i32 = arith.constant 0 : i32
    %c0_i32_0 = arith.constant 0 : i32
    %c0_i32_1 = arith.constant 0 : i32
    return %c0_i32, %c0_i32_0 : i32, i32
  }
  func.func @transform_5(%arg0: i32, %arg1: i32) -> (i32, i32) {
    %c0_i32 = arith.constant 0 : i32
    %c0_i32_0 = arith.constant 0 : i32
    %c0_i32_1 = arith.constant 0 : i32
    return %c0_i32, %c0_i32_0 : i32, i32
  }
  func.func @transform_6(%arg0: i32, %arg1: i32) -> (i32, i32) {
    %c0_i32 = arith.constant 0 : i32
    %c0_i32_0 = arith.constant 0 : i32
    %c0_i32_1 = arith.constant 0 : i32
    return %c0_i32, %c0_i32_0 : i32, i32
  }
  func.func @transform_7(%arg0: i32, %arg1: i32) -> (i32, i32) {
    %c0_i32 = arith.constant 0 : i32
    %c0_i32_0 = arith.constant 0 : i32
    return %arg0, %c0_i32 : i32, i32
  }
}

</mosaic_0001>

<bundles_post_ra>
// kernel: tpu_custom_call.1
= control target key start
LH: loop header
LB: loop body
LE: loop exit
PB: predicated region body
PF: predicated region fallthrough
CT: control target
= control target key end

     0   :  { %12 = vsyncpa [#allocation4], 0  ;;  %s705_s0 = inlined_call_operand.vmem [shape: bf16[16,128], index: 0, kind: input, shape index: {}]   ;;  %s706_s1 = inlined_call_operand.hbm [shape: bf16[128,128], index: 1, kind: input, shape index: {}]   ;;  %s707_s2 = inlined_call_operand.vmem [shape: bf16[16,128], index: 2, kind: input, shape index: {}]   ;;  %s708_s3 = inlined_call_operand.vmem [shape: f32[16,1], index: 3, kind: input, shape index: {}]   ;;  %s709_s4 = inlined_call_operand.hbm [shape: bf16[128,128], index: 4, kind: input, shape index: {}]   ;;  %s710_s5 = inlined_call_operand.hbm [shape: bf16[128,128], index: 5, kind: input, shape index: {}]   ;;  %s711_s6 = inlined_call_operand.vmem [shape: f32[1,128], index: 6, kind: input, shape index: {}]   ;;  %s712_s7 = inlined_call_operand.hbm [shape: f32[16,128], index: 7, kind: output, shape index: {}]  }
   0x1   :  { %13 = vsyncpa [#allocation7], 0 }
   0x2   :  { %14 = vsyncpa [#allocation5], 0  ;;  %s38_s26 = sshll.u32 %s709_s4, 4  ;;  %s629_s27 = smov [#allocation6]   ;;  %s39_s26 = int_to_ptr.hbm [resolvable:$true] %s38_s26 }
   0x3   :  { %s40_s28 = sshll.u32 %s629_s27, 4  ;;  %s21_s8 = sshll.u32 %s706_s1, 4  ;;  %s41_s28 = int_to_ptr.vmem [resolvable:$true] %s40_s28  ;;  %s22_s8 = int_to_ptr.hbm [resolvable:$true] %s21_s8 }
   0x4   :  { %s630_s9 = smov 64   ;;  %s631_s10 = smov 4  }
   0x5   :  { %46 = dma.hbm_to_vmem [thread:$0]  %s39_s26, 1024, %s41_s28, [#allocation7], %s630_s9, %s630_s9, %s631_s10  }
   0x6   :  { %s632_s11 = smov [#allocation3]   ;;  %s51_s15 = sshll.u32 %s710_s5, 4  ;;  %s52_s15 = int_to_ptr.hbm [resolvable:$true] %s51_s15 }
   0x7   :  { %s23_s12 = sshll.u32 %s632_s11, 4  ;;  %s633_s4 = smov [#allocation8]   ;;  %s24_s12 = int_to_ptr.vmem [resolvable:$true] %s23_s12 }
   0x8   :  { %29 = dma.hbm_to_vmem [thread:$0]  %s22_s8, 1024, %s24_s12, [#allocation4], %s630_s9, %s630_s9, %s631_s10  }
   0x9   :  { %s53_s16 = sshll.u32 %s633_s4, 4  ;;  %s54_s16 = int_to_ptr.vmem [resolvable:$true] %s53_s16 }
   0xa   :  { %59 = dma.hbm_to_vmem [thread:$0]  %s52_s15, 1024, %s54_s16, [#allocation7], %s630_s9, %s630_s9, %s631_s10  }
   0xb   :  { %623 = dma.done.wait [#allocation4], 1024  }
   0xc   :  { %624 = vsyncadd [#allocation4], 4294966272 }
   0xd   :  { %625 = dma.done.wait [#allocation7], 2048  }
   0xe   :  { %626 = vsyncadd [#allocation7], 4294965248  ;;  %v498_v0 = vld [vmem:[#allocation3 + $0x38] sm:$0xff]  ;;  %v497_v1 = vld [vmem:[#allocation3 + $0x30] sm:$0xff]  ;;  %v634_v2 = vmov 0   ;;  %s372_s26 = sshll.u32 %s712_s7, 4  ;;  %s373_s26 = int_to_ptr.hbm [resolvable:$true] %s372_s26 }
   0xf   :  { %154 = vmatpush.bf16.msra.mxu0 %v498_v0  ;;  %525 = vset.pattern.permute.xlu0 %v634_v2  ;;  %v177_v3 = vld [vmem:[%s708_s3] sm:$0xff]  ;;  %v515_v4 = vld [vmem:[#allocation8 + $0x38] sm:$0xff]  ;;  %v514_v6 = vld [vmem:[#allocation8 + $0x30] sm:$0xff]  ;;  %s637_s27 = smov 8  }
  0x10   :  { %181 = vperm.xlu0 %525, %v177_v3   ;;  %v506_v5 = vld [vmem:[#allocation6 + $0x38] sm:$0xff]  ;;  %280 = vmatpush.bf16.msra.mxu1 %v515_v4  ;;  %v496_v7 = vld [vmem:[#allocation3 + $0x28] sm:$0xff]  ;;  %v505_v8 = vld [vmem:[#allocation6 + $0x30] sm:$0xff] }
  0x11   :  { %342 = vmatpush.bf16.msra.mxu2 %v506_v5  ;;  %v178_v9 = vld [vmem:[%s708_s3 + $0x8] sm:$0xff]  ;;  %v495_v11 = vld [vmem:[#allocation3 + $0x20] sm:$0xff]  ;;  %v494_v14 = vld [vmem:[#allocation3 + $0x18] sm:$0xff] }
  0x12   :  { %v513_v10 = vld [vmem:[#allocation8 + $0x28] sm:$0xff]  ;;  %v512_v13 = vld [vmem:[#allocation8 + $0x20] sm:$0xff]  ;;  %v493_v15 = vld [vmem:[#allocation3 + $0x10] sm:$0xff] }
  0x13   :  { %155 = vmatpush.bf16.msra.mxu0 %v497_v1  ;;  %v504_v12 = vld [vmem:[#allocation6 + $0x28] sm:$0xff]  ;;  %v491_v17 = vld [vmem:[#allocation3] sm:$0xff]  ;;  %v511_v20 = vld [vmem:[#allocation8 + $0x18] sm:$0xff] }
  0x14   :  { %281 = vmatpush.bf16.msra.mxu1 %v514_v6  ;;  %v492_v16 = vld [vmem:[#allocation3 + $0x8] sm:$0xff]  ;;  %v490_v18 = vld [vmem:[%s705_s0] sm:$0xff]  ;;  %v502_v21 = vld [vmem:[#allocation6 + $0x18] sm:$0xff] }
  0x15   :  { %343 = vmatpush.bf16.msra.mxu2 %v505_v8  ;;  %v503_v19 = vld [vmem:[#allocation6 + $0x20] sm:$0xff]  ;;  %v510_v22 = vld [vmem:[#allocation8 + $0x10] sm:$0xff]  ;;  %v509_v24 = vld [vmem:[#allocation8 + $0x8] sm:$0xff] }
  0x16   :  { %v501_v23 = vld [vmem:[#allocation6 + $0x10] sm:$0xff]  ;;  %v500_v25 = vld [vmem:[#allocation6 + $0x8] sm:$0xff]  ;;  %v508_v26 = vld [vmem:[#allocation8] sm:$0xff] }
  0x17   :  { %156 = vmatpush.bf16.msra.mxu0 %v496_v7  ;;  %v499_v27 = vld [vmem:[#allocation6] sm:$0xff] }
  0x18   :  { %186 = vperm.xlu0 %525, %v178_v9   ;;  %282 = vmatpush.bf16.msra.mxu1 %v513_v10  ;;  %v507_v28 = vld [vmem:[%s707_s2] sm:$0xff]  ;;  %s635_s2 = smov [#allocation9]  }
  0x19   :  { %344 = vmatpush.bf16.msra.mxu2 %v504_v12  ;;  %v526_v37 = vld [vmem:[%s711_s6] ss:$0 sm:$0xff]  ;;  %s370_s23 = sshll.u32 %s635_s2, 4  ;;  %s636_s6 = smov 128   ;;  %s371_s23 = int_to_ptr.vmem [resolvable:$true] %s370_s23 }
  0x1b   :  { %157 = vmatpush.bf16.msra.mxu0 %v495_v11 }
  0x1c   :  { %283 = vmatpush.bf16.msra.mxu1 %v512_v13 }
  0x1d   :  { %345 = vmatpush.bf16.msra.mxu2 %v503_v19 }
  0x1f   :  { %158 = vmatpush.bf16.msra.mxu0 %v494_v14 }
  0x20   :  { %284 = vmatpush.bf16.msra.mxu1 %v511_v20 }
  0x21   :  { %346 = vmatpush.bf16.msra.mxu2 %v502_v21 }
  0x23   :  { %159 = vmatpush.bf16.msra.mxu0 %v493_v15 }
  0x24   :  { %285 = vmatpush.bf16.msra.mxu1 %v510_v22 }
  0x25   :  { %347 = vmatpush.bf16.msra.mxu2 %v501_v23 }
  0x27   :  { %160 = vmatpush.bf16.msra.mxu0 %v492_v16 }
  0x28   :  { %286 = vmatpush.bf16.msra.mxu1 %v509_v24 }
  0x29   :  { %348 = vmatpush.bf16.msra.mxu2 %v500_v25 }
  0x2b   :  { %161 = vmatpush.bf16.msra.mxu0 %v491_v17 }
  0x2c   :  { %287 = vmatpush.bf16.msra.mxu1 %v508_v26 }
  0x2d   :  { %349 = vmatpush.bf16.msra.mxu2 %v499_v27 }
  0x2e   :  { %162 = vmatmul.bf16.vlgmr.msra.gmra.mxu0 %v490_v18 }
  0x2f   :  { %288 = vmatmul.bf16.vlgmr.msra.gmra.mxu1 %v507_v28 }
  0x82   :  { %v182_v29 = vpop.permute.xlu0 %181 }
  0x8a   :  { %v187_v31 = vpop.permute.xlu0 %186 }
  0xab   :  { %v163_v30 = vpop.f32.mrf.mxu0 }
  0xac   :  { %v189_v33 = vmul.f32 %v182_v29, %v163_v30  ;;  %v289_v36 = vpop.f32.mrf.mxu1 }
  0xb3   :  { %v165_v32 = vpop.f32.mrf.mxu0 }
  0xb4   :  { %v190_v34 = vmul.f32 %v187_v31, %v165_v32  ;;  %v291_v42 = vpop.f32.mrf.mxu1 }
  0xb6   :  { %v191_v35 = vpack.c.bf16 %v190_v34, %v189_v33 }
  0xb8   :  { %350 = vmatmul.bf16.vlgmr.msra.gmra.mxu2 %v191_v35 }
 0x13b   :  { %v351_v38 = vpop.f32.mrf.mxu2 }
 0x13c   :  { %v352_v39 = vadd.f32 %v351_v38, %v289_v36 }
 0x13e   :  { %v360_v40 = vadd.f32 %v526_v37, %v352_v39 }
 0x140   :  { %v362_v41 = vmax.f32 %v360_v40, 0.0 }
 0x142   :  { %364 = vst [vmem:[#allocation9] sm:$0xff] %v362_v41 }
 0x143   :  { %v353_v43 = vpop.f32.mrf.mxu2 }
 0x144   :  { %v354_v44 = vadd.f32 %v353_v43, %v291_v42 }
 0x146   :  { %v361_v45 = vadd.f32 %v526_v37, %v354_v44 }
 0x148   :  { %v363_v46 = vmax.f32 %v361_v45, 0.0 }
 0x14a   :  { %365 = vst [vmem:[#allocation9 + $0x8] sm:$0xff] %v363_v46 }
 0x14b   :  { %378 = dma.vmem_to_hbm [thread:$0]  %s371_s23, 256, %s373_s26, [#allocation5], %s636_s6, %s636_s6, %s637_s27  }
 0x14c   :  { %627 = dma.done.wait [#allocation5], 256  }
 0x14d   :  { %628 = vsyncadd [#allocation5], 4294967040 }
 0x14e   :  { %383 = vsyncpa [#allocation4], 1 }
 0x14f   :  { %384 = vsyncpa [#allocation7], 1 }
 0x150   :  { %385 = vsyncpa [#allocation5], 1 }

</bundles_post_ra>
